<compile_context>
chip_gen: v7x
topology: tpu7x:2x2x1
jax: 0.10.0
libtpu: 0.0.40
codegen_flags: <defaults>
</compile_context>

<pallas_src>
import functools

import jax
import jax.numpy as jnp
from jax.experimental import pallas as pl
from jax.experimental.pallas import tpu as pltpu

LANE = 128     # pad feature dims to a multiple of the 128-wide lane axis
SUBLANE = 8    # batch tiles must be a multiple of the sublane count
MAX_TB = 256   # batch tile rows (fills the 256-row MXU on v6e/v7x)


def _round_up(n, m):
    return ((n + m - 1) // m) * m


def _pad_to(a, shape):
    pads = [(0, t - s) for s, t in zip(a.shape, shape)]
    if not any(hi for _, hi in pads):
        return a
    return jnp.pad(a, pads)


def _sigmoid(z):
    # exp (EUP) + approx reciprocal (EUP vrcp): no VALU divide.
    return pl.reciprocal(1.0 + jnp.exp(-z), approx=True)


def _resgen_kernel(x_ref, w1_ref, b1_ref, w2_ref, b2_ref, w3_ref, b3_ref,
                   o_ref, *, matmul_dtype):
    # Whole forward fused: 3 matmuls (MXU, bf16 in / f32 acc), 2 sigmoids (EUP),
    # bias adds + residual add (VPU, f32).
    x = x_ref[...]                                   # (TB, Fp) f32, kept for residual
    xm = x.astype(matmul_dtype)

    z1 = jnp.dot(xm, w1_ref[...], preferred_element_type=jnp.float32) + b1_ref[...]
    h1 = _sigmoid(z1)

    z2 = (jnp.dot(h1.astype(matmul_dtype), w2_ref[...],
                  preferred_element_type=jnp.float32) + b2_ref[...])
    h2 = _sigmoid(z2)

    out = (jnp.dot(h2.astype(matmul_dtype), w3_ref[...],
                   preferred_element_type=jnp.float32)
           + b3_ref[...] + x)                        # residual in f32
    o_ref[...] = out.astype(o_ref.dtype)


def residual_generator(x, w1, b1, w2, b2, w3, b3, *, matmul_dtype=jnp.bfloat16):
    """x: (B, F); weights stored (in, out); biases (1, out).  Returns (B, F)."""
    B, F = x.shape
    L = w1.shape[1]
    Fp = _round_up(F, LANE)
    Lp = _round_up(L, LANE)

    # Batch tiling: fill the MXU M dimension; pad B up to a multiple of the tile.
    Bp = _round_up(B, SUBLANE)
    TB = Bp if Bp < MAX_TB else MAX_TB
    Bp = _round_up(B, TB)
    grid = (Bp // TB,)

    xp = _pad_to(x.astype(jnp.float32), (Bp, Fp))
    w1p = _pad_to(w1, (Fp, Lp)).astype(matmul_dtype)
    w2p = _pad_to(w2, (Lp, Lp)).astype(matmul_dtype)
    w3p = _pad_to(w3, (Lp, Fp)).astype(matmul_dtype)
    b1p = _pad_to(b1, (1, Lp)).astype(jnp.float32)
    b2p = _pad_to(b2, (1, Lp)).astype(jnp.float32)
    b3p = _pad_to(b3, (1, Fp)).astype(jnp.float32)

    wbytes = (w1p.size + w2p.size + w3p.size) * jnp.dtype(matmul_dtype).itemsize
    cost = pl.CostEstimate(
        flops=2 * Bp * (Fp * Lp + Lp * Lp + Lp * Fp),
        transcendentals=2 * Bp * Lp,
        bytes_accessed=(2 * Bp * Fp) * 4 + wbytes
                       + (b1p.size + b2p.size + b3p.size) * 4,
    )

    resident = lambda i: (0, 0)   # same block every step -> stays VMEM-resident

    out = pl.pallas_call(
        functools.partial(_resgen_kernel, matmul_dtype=matmul_dtype),
        out_shape=jax.ShapeDtypeStruct((Bp, Fp), x.dtype),
        grid=grid,
        in_specs=[
            pl.BlockSpec((TB, Fp), lambda i: (i, 0)),   # x: pipelined over batch
            pl.BlockSpec((Fp, Lp), resident),           # w1
            pl.BlockSpec((1, Lp), resident),            # b1
            pl.BlockSpec((Lp, Lp), resident),           # w2
            pl.BlockSpec((1, Lp), resident),            # b2
            pl.BlockSpec((Lp, Fp), resident),           # w3
            pl.BlockSpec((1, Fp), resident),            # b3
        ],
        out_specs=pl.BlockSpec((TB, Fp), lambda i: (i, 0)),
        compiler_params=pltpu.CompilerParams(
            dimension_semantics=("parallel",),          # shard batch tiles on v7x's 2 TCs
        ),
        cost_estimate=cost,
    )(xp, w1p, b1p, w2p, b2p, w3p, b3p)
    return out[:B, :F]


def init_params(key, input_size, layer_size):
    """Mirror PyTorch nn.Linear init shapes; weights stored (in, out), bias (1, out)."""
    ks = jax.random.split(key, 6)

    def uinit(k, shape, fan_in):
        bound = 1.0 / jnp.sqrt(fan_in)
        return jax.random.uniform(k, shape, jnp.float32, -bound, bound)

    w1 = uinit(ks[0], (input_size, layer_size), input_size)
    b1 = uinit(ks[1], (1, layer_size), input_size)
    w2 = uinit(ks[2], (layer_size, layer_size), layer_size)
    b2 = uinit(ks[3], (1, layer_size), layer_size)
    w3 = uinit(ks[4], (layer_size, input_size), layer_size)
    b3 = uinit(ks[5], (1, input_size), layer_size)
    return w1, b1, w2, b2, w3, b3


def residual_generator_ref(x, w1, b1, w2, b2, w3, b3):
    """Plain-JAX f32 reference of the PyTorch forward for validation."""
    h1 = jax.nn.sigmoid(x @ w1 + b1)
    h2 = jax.nn.sigmoid(h1 @ w2 + b2)
    return h2 @ w3 + b3 + x


if __name__ == "__main__":
    key = jax.random.PRNGKey(0)
    k_x, k_p = jax.random.split(key)

    batch = 8
    input_size = 32
    layer_size = 64

    x = jax.random.normal(k_x, (batch, input_size), jnp.float32)
    params = init_params(k_p, input_size, layer_size)

    ref = residual_generator_ref(x, *params)

    # Default (bf16 MXU inputs, f32 accumulation / elementwise).
    out = jax.block_until_ready(residual_generator(x, *params))
    assert out.shape == (batch, input_size)
    assert jnp.allclose(out, ref, atol=3e-2, rtol=3e-2), \
        f"bf16 path mismatch: max abs diff {jnp.max(jnp.abs(out - ref))}"

    # Full-f32 matmul path (e.g. when bf16 error is not acceptable).
    out_f32 = jax.block_until_ready(
        residual_generator(x, *params, matmul_dtype=jnp.float32))
    assert jnp.allclose(out_f32, ref, atol=1e-2, rtol=1e-2), \
        f"f32 path mismatch: max abs diff {jnp.max(jnp.abs(out_f32 - ref))}"

    print("KERNEL_OK")
</pallas_src>

<mosaic_0001>
module attributes {stable_mosaic.version = 11 : i64} {
  func.func @_resgen_kernel(%arg0: i32, %arg1: memref<8x128xf32, #tpu.memory_space<vmem>>, %arg2: memref<128x128xbf16, #tpu.memory_space<vmem>>, %arg3: memref<1x128xf32, #tpu.memory_space<vmem>>, %arg4: memref<128x128xbf16, #tpu.memory_space<vmem>>, %arg5: memref<1x128xf32, #tpu.memory_space<vmem>>, %arg6: memref<128x128xbf16, #tpu.memory_space<vmem>>, %arg7: memref<1x128xf32, #tpu.memory_space<vmem>>, %arg8: memref<8x128xf32, #tpu.memory_space<vmem>>) attributes {dimension_semantics = [#tpu.dimension_semantics<parallel>], iteration_bounds = array<i64: 1>, scalar_prefetch = 0 : i64, scratch_operands = 0 : i64, tpu.core_type = #tpu.core_type<tc>, window_params = [{transform_indices = @transform_0, window_bounds = array<i64: 8, 128>}, {pipeline_mode = #tpu.pipeline_mode<synchronous>, transform_indices = @transform_1, window_bounds = array<i64: 128, 128>}, {pipeline_mode = #tpu.pipeline_mode<synchronous>, transform_indices = @transform_2, window_bounds = array<i64: 1, 128>}, {pipeline_mode = #tpu.pipeline_mode<synchronous>, transform_indices = @transform_3, window_bounds = array<i64: 128, 128>}, {pipeline_mode = #tpu.pipeline_mode<synchronous>, transform_indices = @transform_4, window_bounds = array<i64: 1, 128>}, {pipeline_mode = #tpu.pipeline_mode<synchronous>, transform_indices = @transform_5, window_bounds = array<i64: 128, 128>}, {pipeline_mode = #tpu.pipeline_mode<synchronous>, transform_indices = @transform_6, window_bounds = array<i64: 1, 128>}, {transform_indices = @transform_7, window_bounds = array<i64: 8, 128>}]} {
    %c0 = arith.constant 0 : index
    %c0_0 = arith.constant 0 : index
    %0 = vector.load %arg1[%c0, %c0_0] : memref<8x128xf32, #tpu.memory_space<vmem>>, vector<8x128xf32>
    %1 = arith.truncf %0 : vector<8x128xf32> to vector<8x128xbf16>
    %c0_1 = arith.constant 0 : index
    %c0_2 = arith.constant 0 : index
    %2 = vector.load %arg2[%c0_1, %c0_2] : memref<128x128xbf16, #tpu.memory_space<vmem>>, vector<128x128xbf16>
    %cst = arith.constant dense<0.000000e+00> : vector<8x128xf32>
    %3 = tpu.matmul %1, %2, %cst {dimension_numbers = #tpu.dot_dimension_numbers<[1], [0], [0], [1], [0, 0, 1, 1], [], []>} : vector<8x128xbf16>, vector<128x128xbf16>, vector<8x128xf32> -> vector<8x128xf32>
    %c0_3 = arith.constant 0 : index
    %c0_4 = arith.constant 0 : index
    %4 = vector.load %arg3[%c0_3, %c0_4] : memref<1x128xf32, #tpu.memory_space<vmem>>, vector<1x128xf32>
    %5 = vector.broadcast %4 : vector<1x128xf32> to vector<8x128xf32>
    %6 = arith.addf %3, %5 : vector<8x128xf32>
    %cst_5 = arith.constant 0.000000e+00 : f32
    %7 = vector.broadcast %cst_5 : f32 to vector<8x128xf32>
    %8 = arith.subf %7, %6 : vector<8x128xf32>
    %9 = math.exp %8 : vector<8x128xf32>
    %cst_6 = arith.constant 1.000000e+00 : f32
    %10 = vector.broadcast %cst_6 : f32 to vector<8x128xf32>
    %11 = arith.addf %10, %9 : vector<8x128xf32>
    %12 = tpu.reciprocal %11 {approx = true} : vector<8x128xf32> -> vector<8x128xf32>
    %13 = arith.truncf %12 : vector<8x128xf32> to vector<8x128xbf16>
    %c0_7 = arith.constant 0 : index
    %c0_8 = arith.constant 0 : index
    %14 = vector.load %arg4[%c0_7, %c0_8] : memref<128x128xbf16, #tpu.memory_space<vmem>>, vector<128x128xbf16>
    %cst_9 = arith.constant dense<0.000000e+00> : vector<8x128xf32>
    %15 = tpu.matmul %13, %14, %cst_9 {dimension_numbers = #tpu.dot_dimension_numbers<[1], [0], [0], [1], [0, 0, 1, 1], [], []>} : vector<8x128xbf16>, vector<128x128xbf16>, vector<8x128xf32> -> vector<8x128xf32>
    %c0_10 = arith.constant 0 : index
    %c0_11 = arith.constant 0 : index
    %16 = vector.load %arg5[%c0_10, %c0_11] : memref<1x128xf32, #tpu.memory_space<vmem>>, vector<1x128xf32>
    %17 = vector.broadcast %16 : vector<1x128xf32> to vector<8x128xf32>
    %18 = arith.addf %15, %17 : vector<8x128xf32>
    %cst_12 = arith.constant 0.000000e+00 : f32
    %19 = vector.broadcast %cst_12 : f32 to vector<8x128xf32>
    %20 = arith.subf %19, %18 : vector<8x128xf32>
    %21 = math.exp %20 : vector<8x128xf32>
    %cst_13 = arith.constant 1.000000e+00 : f32
    %22 = vector.broadcast %cst_13 : f32 to vector<8x128xf32>
    %23 = arith.addf %22, %21 : vector<8x128xf32>
    %24 = tpu.reciprocal %23 {approx = true} : vector<8x128xf32> -> vector<8x128xf32>
    %25 = arith.truncf %24 : vector<8x128xf32> to vector<8x128xbf16>
    %c0_14 = arith.constant 0 : index
    %c0_15 = arith.constant 0 : index
    %26 = vector.load %arg6[%c0_14, %c0_15] : memref<128x128xbf16, #tpu.memory_space<vmem>>, vector<128x128xbf16>
    %cst_16 = arith.constant dense<0.000000e+00> : vector<8x128xf32>
    %27 = tpu.matmul %25, %26, %cst_16 {dimension_numbers = #tpu.dot_dimension_numbers<[1], [0], [0], [1], [0, 0, 1, 1], [], []>} : vector<8x128xbf16>, vector<128x128xbf16>, vector<8x128xf32> -> vector<8x128xf32>
    %c0_17 = arith.constant 0 : index
    %c0_18 = arith.constant 0 : index
    %28 = vector.load %arg7[%c0_17, %c0_18] : memref<1x128xf32, #tpu.memory_space<vmem>>, vector<1x128xf32>
    %29 = vector.broadcast %28 : vector<1x128xf32> to vector<8x128xf32>
    %30 = arith.addf %27, %29 : vector<8x128xf32>
    %31 = arith.addf %30, %0 : vector<8x128xf32>
    %c0_19 = arith.constant 0 : index
    %c0_20 = arith.constant 0 : index
    %32 = vector.load %arg8[%c0_19, %c0_20] : memref<8x128xf32, #tpu.memory_space<vmem>>, vector<8x128xf32>
    tpu.vector_store %arg8[%c0_19, %c0_20], %31 {strides = array<i32>} : memref<8x128xf32, #tpu.memory_space<vmem>>, vector<8x128xf32>,
    return
  }
  func.func @transform_0(%arg0: i32) -> (i32, i32) {
    %c0_i32 = arith.constant 0 : i32
    %c0_i32_0 = arith.constant 0 : i32
    return %arg0, %c0_i32 : i32, i32
  }
  func.func @transform_1(%arg0: i32) -> (i32, i32) {
    %c0_i32 = arith.constant 0 : i32
    %c0_i32_0 = arith.constant 0 : i32
    %c0_i32_1 = arith.constant 0 : i32
    return %c0_i32, %c0_i32_0 : i32, i32
  }
  func.func @transform_2(%arg0: i32) -> (i32, i32) {
    %c0_i32 = arith.constant 0 : i32
    %c0_i32_0 = arith.constant 0 : i32
    %c0_i32_1 = arith.constant 0 : i32
    return %c0_i32, %c0_i32_0 : i32, i32
  }
  func.func @transform_3(%arg0: i32) -> (i32, i32) {
    %c0_i32 = arith.constant 0 : i32
    %c0_i32_0 = arith.constant 0 : i32
    %c0_i32_1 = arith.constant 0 : i32
    return %c0_i32, %c0_i32_0 : i32, i32
  }
  func.func @transform_4(%arg0: i32) -> (i32, i32) {
    %c0_i32 = arith.constant 0 : i32
    %c0_i32_0 = arith.constant 0 : i32
    %c0_i32_1 = arith.constant 0 : i32
    return %c0_i32, %c0_i32_0 : i32, i32
  }
  func.func @transform_5(%arg0: i32) -> (i32, i32) {
    %c0_i32 = arith.constant 0 : i32
    %c0_i32_0 = arith.constant 0 : i32
    %c0_i32_1 = arith.constant 0 : i32
    return %c0_i32, %c0_i32_0 : i32, i32
  }
  func.func @transform_6(%arg0: i32) -> (i32, i32) {
    %c0_i32 = arith.constant 0 : i32
    %c0_i32_0 = arith.constant 0 : i32
    %c0_i32_1 = arith.constant 0 : i32
    return %c0_i32, %c0_i32_0 : i32, i32
  }
  func.func @transform_7(%arg0: i32) -> (i32, i32) {
    %c0_i32 = arith.constant 0 : i32
    %c0_i32_0 = arith.constant 0 : i32
    return %arg0, %c0_i32 : i32, i32
  }
}

</mosaic_0001>

<bundles_post_ra>
// kernel: tpu_custom_call.1
= control target key start
LH: loop header
LB: loop body
LE: loop exit
PB: predicated region body
PF: predicated region fallthrough
CT: control target
= control target key end

     0   :  { %12 = vsyncpa [#allocation3], 0  ;;  %s882_s0 = inlined_call_operand.hbm [shape: f32[8,128], index: 0, kind: input, shape index: {}]   ;;  %s883_s1 = inlined_call_operand.hbm [shape: bf16[128,128], index: 1, kind: input, shape index: {}]   ;;  %s884_s2 = inlined_call_operand.vmem [shape: f32[1,128], index: 2, kind: input, shape index: {}]   ;;  %s885_s3 = inlined_call_operand.hbm [shape: bf16[128,128], index: 3, kind: input, shape index: {}]   ;;  %s886_s4 = inlined_call_operand.vmem [shape: f32[1,128], index: 4, kind: input, shape index: {}]   ;;  %s887_s5 = inlined_call_operand.hbm [shape: bf16[128,128], index: 5, kind: input, shape index: {}]   ;;  %s888_s6 = inlined_call_operand.vmem [shape: f32[1,128], index: 6, kind: input, shape index: {}]   ;;  %s889_s7 = inlined_call_operand.hbm [shape: f32[8,128], index: 7, kind: output, shape index: {}]  }
   0x1   :  { %13 = vsyncpa [#allocation6], 0 }
   0x2   :  { %14 = vsyncpa [#allocation9], 0 }
   0x3   :  { %15 = vsyncpa [#allocation4], 0  ;;  %s720_s24 = smov [#allocation5]   ;;  %s602_s28 = scalar_lea.hbm %s883_s1, 1024 }
   0x4   :  { %s31_s25 = sshll.u32 %s720_s24, 4  ;;  %p603_p0 = scmp.ne.s32.totalorder %s883_s1, %s602_s28  ;;  %s32_s25 = int_to_ptr.vmem [resolvable:$true] %s31_s25 }
   0x5   :  { %p606_p1 = scmp.lt.u32.totalorder %s602_s28, %s883_s1 }
   0x7   :  { %p608_p2 = pnand %p606_p1, %p603_p0 }
   0x9   :  { %611 = shalt.err (!%p608_p2)
}
   0xa   :  { %s612_s10 = scalar_lea.vmem %s32_s25, 1024  ;;  %p617_p4 = scmp.lt.s32.totalorder %s32_s25, %s32_s25 }
   0xb   :  { %p613_p3 = scmp.ne.s32.totalorder %s32_s25, %s612_s10  ;;  %p618_p5 = scmp.lt.s32.totalorder %s612_s10, %s612_s10 }
   0xd   :  { %p619_p6 = por %p618_p5, %p617_p4 }
   0xf   :  { %p620_p7 = pnand %p619_p6, %p613_p3 }
  0x11   :  { %623 = shalt.err (!%p620_p7)
}
  0x12   :  { %s721_s11 = smov 64   ;;  %s722_s12 = smov 4  }
  0x13   :  { %37 = dma.hbm_to_vmem [thread:$0]  %s883_s1, 1024, %s32_s25, [#allocation6], %s721_s11, %s721_s11, %s722_s12  }
  0x14   :  { %s723_s15 = smov [#allocation2]   ;;  %s724_s17 = smov [#allocation7]  }
  0x15   :  { %s22_s16 = sshll.u32 %s723_s15, 4  ;;  %s45_s18 = sshll.u32 %s724_s17, 4  ;;  %s23_s16 = int_to_ptr.vmem [resolvable:$true] %s22_s16  ;;  %s46_s18 = int_to_ptr.vmem [resolvable:$true] %s45_s18 }
  0x16   :  { %s624_s21 = scalar_lea.hbm %s882_s0, 128 }
  0x17   :  { %p625_p8 = scmp.ne.s32.totalorder %s882_s0, %s624_s21  ;;  %p628_p9 = scmp.lt.u32.totalorder %s624_s21, %s882_s0 }
  0x19   :  { %p630_p10 = pnand %p628_p9, %p625_p8 }
  0x1b   :  { %633 = shalt.err (!%p630_p10)
}
  0x1c   :  { %s634_s1 = scalar_lea.vmem %s23_s16, 128  ;;  %p639_p12 = scmp.lt.s32.totalorder %s23_s16, %s23_s16 }
  0x1d   :  { %p635_p11 = scmp.ne.s32.totalorder %s23_s16, %s634_s1  ;;  %p640_p13 = scmp.lt.s32.totalorder %s634_s1, %s634_s1 }
  0x1f   :  { %p641_p0 = por %p640_p13, %p639_p12 }
  0x21   :  { %p642_p1 = pnand %p641_p0, %p635_p11 }
  0x23   :  { %645 = shalt.err (!%p642_p1)
}
  0x24   :  { %25 = dma.hbm_to_vmem [thread:$0]  %s882_s0, 128, %s23_s16, [#allocation3]  }
  0x25   :  { %s646_s30 = scalar_lea.hbm %s885_s3, 1024 }
  0x26   :  { %p647_p2 = scmp.ne.s32.totalorder %s885_s3, %s646_s30  ;;  %p650_p3 = scmp.lt.u32.totalorder %s646_s30, %s885_s3 }
  0x28   :  { %p652_p4 = pnand %p650_p3, %p647_p2 }
  0x2a   :  { %655 = shalt.err (!%p652_p4)
}
  0x2b   :  { %s656_s14 = scalar_lea.vmem %s46_s18, 1024  ;;  %p661_p6 = scmp.lt.s32.totalorder %s46_s18, %s46_s18 }
  0x2c   :  { %p657_p5 = scmp.ne.s32.totalorder %s46_s18, %s656_s14  ;;  %p662_p7 = scmp.lt.s32.totalorder %s656_s14, %s656_s14 }
  0x2e   :  { %p663_p8 = por %p662_p7, %p661_p6 }
  0x30   :  { %p664_p9 = pnand %p663_p8, %p657_p5 }
  0x32   :  { %667 = shalt.err (!%p664_p9)
}
  0x33   :  { %51 = dma.hbm_to_vmem [thread:$0]  %s885_s3, 1024, %s46_s18, [#allocation6], %s721_s11, %s721_s11, %s722_s12  }
  0x34   :  { %s725_s16 = smov [#allocation8]   ;;  %s668_s21 = scalar_lea.hbm %s887_s5, 1024 }
  0x35   :  { %s59_s17 = sshll.u32 %s725_s16, 4  ;;  %p669_p10 = scmp.ne.s32.totalorder %s887_s5, %s668_s21  ;;  %s60_s17 = int_to_ptr.vmem [resolvable:$true] %s59_s17 }
  0x36   :  { %p672_p11 = scmp.lt.u32.totalorder %s668_s21, %s887_s5 }
  0x38   :  { %p674_p12 = pnand %p672_p11, %p669_p10 }
  0x3a   :  { %677 = shalt.err (!%p674_p12)
}
  0x3b   :  { %s678_s1 = scalar_lea.vmem %s60_s17, 1024  ;;  %p683_p0 = scmp.lt.s32.totalorder %s60_s17, %s60_s17 }
  0x3c   :  { %p679_p13 = scmp.ne.s32.totalorder %s60_s17, %s678_s1  ;;  %p684_p1 = scmp.lt.s32.totalorder %s678_s1, %s678_s1 }
  0x3e   :  { %p685_p2 = por %p684_p1, %p683_p0 }
  0x40   :  { %p686_p3 = pnand %p685_p2, %p679_p13 }
  0x42   :  { %689 = shalt.err (!%p686_p3)
}
  0x43   :  { %65 = dma.hbm_to_vmem [thread:$0]  %s887_s5, 1024, %s60_s17, [#allocation9], %s721_s11, %s721_s11, %s722_s12  }
  0x44   :  { %712 = dma.done.wait [#allocation3], 128  }
  0x45   :  { %713 = vsyncadd [#allocation3], 4294967168 }
  0x46   :  { %714 = dma.done.wait [#allocation6], 2048  }
  0x47   :  { %715 = vsyncadd [#allocation6], 4294965248 }
  0x48   :  { %716 = dma.done.wait [#allocation9], 1024  }
  0x49   :  { %717 = vsyncadd [#allocation9], 4294966272  ;;  %v726_v0 = vmov 0.0   ;;  %vm727_vm0 = vmmov 0   ;;  %v570_v1 = vld [vmem:[#allocation5] sm:$0xff]   ;;  %v571_v2 = vld [vmem:[#allocation5 + $0x8] sm:$0xff]  }
  0x4a   :  { %501 = vmatprep.subr.bf16.mxu0 %v726_v0  ;;  %517 = vmatprep.mubr.msk.bf16.mxu0 %vm727_vm0, %v726_v0  ;;  %v572_v3 = vld [vmem:[#allocation5 + $0x10] sm:$0xff]   ;;  %v573_v4 = vld [vmem:[#allocation5 + $0x18] sm:$0xff]   ;;  %v574_v5 = vld [vmem:[#allocation5 + $0x20] sm:$0xff]  }
  0x4b   :  { %521 = vmatprep.subr.bf16.mxu1 %v726_v0  ;;  %537 = vmatprep.mubr.msk.bf16.mxu1 %vm727_vm0, %v726_v0  ;;  %v575_v6 = vld [vmem:[#allocation5 + $0x28] sm:$0xff]   ;;  %v576_v7 = vld [vmem:[#allocation5 + $0x30] sm:$0xff]   ;;  %v577_v8 = vld [vmem:[#allocation5 + $0x38] sm:$0xff]  }
  0x4c   :  { %502 = vmatpush3.bf16.msra.mxu0 %v570_v1  ;;  %v838_v9 = vld [vmem:[#allocation2] sm:$0xff]  ;;  %v578_v11 = vld [vmem:[#allocation7] sm:$0xff]   ;;  %v579_v12 = vld [vmem:[#allocation7 + $0x8] sm:$0xff]  }
  0x4d   :  { %503 = vmatprep.subr.bf16.mxu0 %v726_v0  ;;  %v82_v10 = vpack.c.bf16 %v838_v9, %v838_v9  ;;  %522 = vmatpush3.bf16.msra.mxu1 %v578_v11  ;;  %v580_v13 = vld [vmem:[#allocation7 + $0x10] sm:$0xff]   ;;  %v581_v14 = vld [vmem:[#allocation7 + $0x18] sm:$0xff]   ;;  %v582_v15 = vld [vmem:[#allocation7 + $0x20] sm:$0xff]  }
  0x4e   :  { %523 = vmatprep.subr.bf16.mxu1 %v726_v0  ;;  %v583_v16 = vld [vmem:[#allocation7 + $0x28] sm:$0xff]   ;;  %v584_v17 = vld [vmem:[#allocation7 + $0x30] sm:$0xff]   ;;  %v585_v18 = vld [vmem:[#allocation7 + $0x38] sm:$0xff]  }
  0x4f   :  { %v447_v19 = vld [vmem:[%s884_s2] ss:$0 sm:$0xff]  ;;  %v586_v31 = vld [vmem:[#allocation8] sm:$0xff]   ;;  %v587_v32 = vld [vmem:[#allocation8 + $0x8] sm:$0xff]  }
  0x50   :  { %504 = vmatpush3.bf16.msra.mxu0 %v571_v2  ;;  %v588_v33 = vld [vmem:[#allocation8 + $0x10] sm:$0xff]   ;;  %v589_v34 = vld [vmem:[#allocation8 + $0x18] sm:$0xff]   ;;  %v590_v35 = vld [vmem:[#allocation8 + $0x20] sm:$0xff]  }
  0x51   :  { %505 = vmatprep.subr.bf16.mxu0 %v726_v0  ;;  %524 = vmatpush3.bf16.msra.mxu1 %v579_v12  ;;  %v591_v36 = vld [vmem:[#allocation8 + $0x28] sm:$0xff]   ;;  %v592_v37 = vld [vmem:[#allocation8 + $0x30] sm:$0xff]   ;;  %v593_v38 = vld [vmem:[#allocation8 + $0x38] sm:$0xff]  }
  0x52   :  { %525 = vmatprep.subr.bf16.mxu1 %v726_v0  ;;  %v456_v39 = vld [vmem:[%s886_s4] ss:$0 sm:$0xff]  ;;  %s728_s4 = smov [#allocation10]  }
  0x53   :  { %v465_v51 = vld [vmem:[%s888_s6] ss:$0 sm:$0xff]  ;;  %s436_s28 = sshll.u32 %s728_s4, 4  ;;  %s437_s28 = int_to_ptr.vmem [resolvable:$true] %s436_s28 }
  0x54   :  { %506 = vmatpush3.bf16.msra.mxu0 %v572_v3  ;;  %s690_s29 = scalar_lea.vmem %s437_s28, 128  ;;  %p695_p5 = scmp.lt.s32.totalorder %s437_s28, %s437_s28 }
  0x55   :  { %507 = vmatprep.subr.bf16.mxu0 %v726_v0  ;;  %526 = vmatpush3.bf16.msra.mxu1 %v580_v13  ;;  %p691_p4 = scmp.ne.s32.totalorder %s437_s28, %s690_s29  ;;  %p696_p6 = scmp.lt.s32.totalorder %s690_s29, %s690_s29 }
  0x56   :  { %527 = vmatprep.subr.bf16.mxu1 %v726_v0 }
  0x57   :  { %p697_p7 = por %p696_p6, %p695_p5 }
  0x58   :  { %508 = vmatpush3.bf16.msra.mxu0 %v573_v4 }
  0x59   :  { %509 = vmatprep.subr.bf16.mxu0 %v726_v0  ;;  %528 = vmatpush3.bf16.msra.mxu1 %v581_v14  ;;  %p698_p8 = pnand %p697_p7, %p691_p4 }
  0x5a   :  { %529 = vmatprep.subr.bf16.mxu1 %v726_v0 }
  0x5c   :  { %510 = vmatpush3.bf16.msra.mxu0 %v574_v5 }
  0x5d   :  { %511 = vmatprep.subr.bf16.mxu0 %v726_v0  ;;  %530 = vmatpush3.bf16.msra.mxu1 %v582_v15 }
  0x5e   :  { %531 = vmatprep.subr.bf16.mxu1 %v726_v0 }
  0x60   :  { %512 = vmatpush3.bf16.msra.mxu0 %v575_v6 }
  0x61   :  { %513 = vmatprep.subr.bf16.mxu0 %v726_v0  ;;  %532 = vmatpush3.bf16.msra.mxu1 %v583_v16 }
  0x62   :  { %533 = vmatprep.subr.bf16.mxu1 %v726_v0 }
  0x64   :  { %514 = vmatpush3.bf16.msra.mxu0 %v576_v7 }
  0x65   :  { %515 = vmatprep.subr.bf16.mxu0 %v726_v0  ;;  %534 = vmatpush3.bf16.msra.mxu1 %v584_v17 }
  0x66   :  { %535 = vmatprep.subr.bf16.mxu1 %v726_v0 }
  0x68   :  { %516 = vmatpush3.bf16.msra.mxu0 %v577_v8 }
  0x69   :  { %541 = vmatprep.subr.bf16.mxu0 %v726_v0  ;;  %536 = vmatpush3.bf16.msra.mxu1 %v585_v18 }
  0x6b   :  { %518 = vmatmul.mubr.bf16.vlgmr.msra.gmra.mrb[0].mxu0 %v82_v10 }
  0x6c   :  { %557 = vmatprep.mubr.msk.bf16.mxu0 %vm727_vm0, %v726_v0  ;;  %542 = vmatpush3.bf16.msra.mxu0 %v586_v31 }
  0x6d   :  { %543 = vmatprep.subr.bf16.mxu0 %v726_v0 }
  0x70   :  { %544 = vmatpush3.bf16.msra.mxu0 %v587_v32 }
  0x71   :  { %545 = vmatprep.subr.bf16.mxu0 %v726_v0 }
  0x74   :  { %546 = vmatpush3.bf16.msra.mxu0 %v588_v33 }
  0x75   :  { %547 = vmatprep.subr.bf16.mxu0 %v726_v0 }
  0x78   :  { %548 = vmatpush3.bf16.msra.mxu0 %v589_v34 }
  0x79   :  { %549 = vmatprep.subr.bf16.mxu0 %v726_v0 }
  0x7c   :  { %550 = vmatpush3.bf16.msra.mxu0 %v590_v35 }
  0x7d   :  { %551 = vmatprep.subr.bf16.mxu0 %v726_v0 }
  0x80   :  { %552 = vmatpush3.bf16.msra.mxu0 %v591_v36 }
  0x81   :  { %553 = vmatprep.subr.bf16.mxu0 %v726_v0 }
  0x84   :  { %554 = vmatpush3.bf16.msra.mxu0 %v592_v37 }
  0x85   :  { %555 = vmatprep.subr.bf16.mxu0 %v726_v0 }
  0x88   :  { %556 = vmatpush3.bf16.msra.mxu0 %v593_v38 }
 0x13e   :  { %v188_v20 = vpop.f32.mrb[0].mxu0 }
 0x13f   :  { %v189_v21 = vadd.f32 %v447_v19, %v188_v20  ;;  %v519_v22 = vpop.f32.mrb[1].mxu0 }
 0x140   :  { %v191_v23 = vpop.f32.mrb[2].mxu0 }
 0x141   :  { %v194_v24 = vsub.f32 0.0, %v189_v21  ;;  %v520_v25 = vpop.f32.mrb[3].mxu0 }
 0x143   :  { %v195_v26 = vmul.f32 1.442695, %v194_v24 }
 0x145   :  { %594 = vpow2.f32 %v195_v26 }
 0x14f   :  { %v595_v27 = vpop.eup %594 }
 0x150   :  { %v197_v28 = vadd.f32 1.0, %v595_v27 }
 0x152   :  { %596 = vrcp.f32 %v197_v28 }
 0x15c   :  { %v597_v29 = vpop.eup %596 }
 0x15d   :  { %v199_v30 = vpack.c.bf16 %v597_v29, %v597_v29 }
 0x15f   :  { %538 = vmatmul.mubr.bf16.vlgmr.msra.gmra.mrb[0].mxu1 %v199_v30 }
 0x232   :  { %v305_v40 = vpop.f32.mrb[0].mxu1 }
 0x233   :  { %v306_v41 = vadd.f32 %v456_v39, %v305_v40  ;;  %v539_v42 = vpop.f32.mrb[1].mxu1 }
 0x234   :  { %v308_v43 = vpop.f32.mrb[2].mxu1 }
 0x235   :  { %v311_v44 = vsub.f32 0.0, %v306_v41  ;;  %v540_v45 = vpop.f32.mrb[3].mxu1 }
 0x237   :  { %v312_v46 = vmul.f32 1.442695, %v311_v44 }
 0x239   :  { %598 = vpow2.f32 %v312_v46 }
 0x243   :  { %v599_v47 = vpop.eup %598 }
 0x244   :  { %v314_v48 = vadd.f32 1.0, %v599_v47 }
 0x246   :  { %600 = vrcp.f32 %v314_v48 }
 0x250   :  { %v601_v49 = vpop.eup %600 }
 0x251   :  { %v316_v50 = vpack.c.bf16 %v601_v49, %v601_v49 }
 0x253   :  { %558 = vmatmul.mubr.bf16.vlgmr.msra.gmra.mrb[4].mxu0 %v316_v50 }
 0x326   :  { %v422_v52 = vpop.f32.mrb[4].mxu0 }
 0x327   :  { %v423_v53 = vadd.f32 %v465_v51, %v422_v52  ;;  %v559_v54 = vpop.f32.mrb[5].mxu0 }
 0x328   :  { %v425_v55 = vpop.f32.mrb[6].mxu0 }
 0x329   :  { %v428_v56 = vadd.f32 %v423_v53, %v838_v9  ;;  %v560_v57 = vpop.f32.mrb[7].mxu0 }
 0x32b   :  { %429 = vst [vmem:[#allocation10] sm:$0xff] %v428_v56 }
 0x32c   :  { %701 = shalt.err (!%p698_p8)
}
 0x32d   :  { %s702_s8 = scalar_lea.hbm %s889_s7, 128 }
 0x32e   :  { %p703_p9 = scmp.ne.s32.totalorder %s889_s7, %s702_s8  ;;  %p706_p10 = scmp.lt.u32.totalorder %s702_s8, %s889_s7 }
 0x330   :  { %p708_p11 = pnand %p706_p10, %p703_p9 }
 0x332   :  { %711 = shalt.err (!%p708_p11)
}
 0x333   :  { %439 = dma.vmem_to_hbm [thread:$0]  %s437_s28, 128, %s889_s7, [#allocation4]  }
 0x334   :  { %718 = dma.done.wait [#allocation4], 128  }
 0x335   :  { %719 = vsyncadd [#allocation4], 4294967168 }
 0x336   :  { %443 = vsyncpa [#allocation3], 1 }
 0x337   :  { %444 = vsyncpa [#allocation6], 1 }
 0x338   :  { %445 = vsyncpa [#allocation9], 1 }
 0x339   :  { %446 = vsyncpa [#allocation4], 1 }

</bundles_post_ra>
